<compile_context>
chip_gen: v7x
topology: tpu7x:2x2x1
jax: 0.10.0
libtpu: 0.0.40
codegen_flags: <defaults>
</compile_context>

<pallas_src>
import jax
import jax.numpy as jnp
from jax.experimental import pallas as pl
from jax.experimental.pallas import tpu as pltpu


# ---------------------------------------------------------------------------
# Phase 1: input projection  xproj = x @ Wx_fused + b_fused   (no recurrence)
# ---------------------------------------------------------------------------
def _input_proj_kernel(x_ref, wx_ref, b_ref, xp_ref):
    # x_ref: (ROW_BLK, D), wx_ref: (D, 4H), b_ref: (1, 4H), xp_ref: (ROW_BLK, 4H)
    xp_ref[...] = (
        jnp.dot(x_ref[...], wx_ref[...], preferred_element_type=jnp.float32)
        + b_ref[...]
    ).astype(xp_ref.dtype)


# ---------------------------------------------------------------------------
# Phase 2: sequential recurrence over time blocks
# ---------------------------------------------------------------------------
def _recurrence_kernel(xp_ref, wh_ref, out_ref, hN_ref, cN_ref, h_scr, c_scr):
    # xp_ref: (T_BLK, B, 4H), wh_ref: (H, 4H), out_ref: (T_BLK, B, H)
    tb = pl.program_id(0)

    # h_0 / c_0 default to zeros (hx=None path of the PyTorch module).
    @pl.when(tb == 0)
    def _():
        h_scr[...] = jnp.zeros_like(h_scr)
        c_scr[...] = jnp.zeros_like(c_scr)

    t_blk = xp_ref.shape[0]
    H = wh_ref.shape[0]
    wh = wh_ref[...]  # hoisted; resident for the whole block

    def step(i, carry):
        h, c = carry
        # Single fused-gate matmul per timestep: (B, H) x (H, 4H) -> (B, 4H).
        pre = xp_ref[i] + jnp.dot(h, wh, preferred_element_type=jnp.float32)
        ft = jax.nn.sigmoid(pre[:, 0 * H:1 * H])
        it = jax.nn.sigmoid(pre[:, 1 * H:2 * H])
        ct_hat = jnp.tanh(pre[:, 2 * H:3 * H])
        ot = jax.nn.sigmoid(pre[:, 3 * H:4 * H])
        c_new = ft * c + it + ct_hat          # faithful to reference: it ADDED
        h_new = ot * jnp.tanh(c_new)
        out_ref[i] = h_new.astype(out_ref.dtype)
        return h_new, c_new

    h, c = jax.lax.fori_loop(0, t_blk, step, (h_scr[...], c_scr[...]),
                             unroll=True)
    h_scr[...] = h
    c_scr[...] = c

    @pl.when(tb == pl.num_programs(0) - 1)
    def _():
        hN_ref[...] = h.astype(hN_ref.dtype)
        cN_ref[...] = c.astype(cN_ref.dtype)


# ---------------------------------------------------------------------------
# Wrapper
# ---------------------------------------------------------------------------
def _pick_time_block(seq_len, max_blk=32):
    """Largest divisor of seq_len that is <= max_blk (amortizes grid overhead)."""
    for cand in range(min(seq_len, max_blk), 0, -1):
        if seq_len % cand == 0:
            return cand
    return 1


def _pick_row_block(rows, max_rows=1024):
    """Divisor of rows, preferably a multiple of 8, for the projection matmul."""
    for cand in range(min(rows, max_rows), 0, -1):
        if rows % cand == 0 and (cand % 8 == 0 or cand == rows):
            return cand
    return rows


def lstm_forward(x, wx, wh, b, *, t_blk=None):
    """x: (S, B, D) f32; wx: (D, 4H); wh: (H, 4H); b: (1, 4H). Gates [f,i,C,o]."""
    S, B, D = x.shape
    H = wh.shape[0]
    G = 4 * H

    if t_blk is None:
        t_blk = _pick_time_block(S)
    n_tblk = S // t_blk

    # ---- Phase 1: input projection, fully parallel over seq*batch rows. ----
    rows = S * B
    row_blk = _pick_row_block(rows)
    x2 = x.reshape(rows, D)                       # wrapper-side reshape (free)
    xproj2 = pl.pallas_call(
        _input_proj_kernel,
        out_shape=jax.ShapeDtypeStruct((rows, G), jnp.float32),
        grid_spec=pltpu.PrefetchScalarGridSpec(
            num_scalar_prefetch=0,
            grid=(rows // row_blk,),
            in_specs=[
                pl.BlockSpec((row_blk, D), lambda r: (r, 0)),
                pl.BlockSpec((D, G), lambda r: (0, 0)),   # Wx resident
                pl.BlockSpec((1, G), lambda r: (0, 0)),   # bias resident
            ],
            out_specs=pl.BlockSpec((row_blk, G), lambda r: (r, 0)),
        ),
        compiler_params=pltpu.CompilerParams(
            dimension_semantics=("parallel",)),
    )(x2, wx, b)
    xproj = xproj2.reshape(S, B, G)

    # ---- Phase 2: sequential recurrence over time blocks. ----
    out, h_n, c_n = pl.pallas_call(
        _recurrence_kernel,
        out_shape=(
            jax.ShapeDtypeStruct((S, B, H), x.dtype),   # output (all h_t)
            jax.ShapeDtypeStruct((B, H), x.dtype),      # h_n
            jax.ShapeDtypeStruct((B, H), x.dtype),      # c_n
        ),
        grid_spec=pltpu.PrefetchScalarGridSpec(
            num_scalar_prefetch=0,
            grid=(n_tblk,),
            in_specs=[
                pl.BlockSpec((t_blk, B, G), lambda t: (t, 0, 0)),
                pl.BlockSpec((H, G), lambda t: (0, 0)),   # Wh resident
            ],
            out_specs=[
                pl.BlockSpec((t_blk, B, H), lambda t: (t, 0, 0)),
                pl.BlockSpec((B, H), lambda t: (0, 0)),
                pl.BlockSpec((B, H), lambda t: (0, 0)),
            ],
            scratch_shapes=[
                pltpu.VMEM((B, H), jnp.float32),   # h carry (kept in f32)
                pltpu.VMEM((B, H), jnp.float32),   # c carry (kept in f32)
            ],
        ),
        compiler_params=pltpu.CompilerParams(
            dimension_semantics=("arbitrary",)),   # true sequential recurrence
    )(xproj, wh)
    return out, (h_n, c_n)


# ---------------------------------------------------------------------------
# Pure-JAX reference mirroring the PyTorch module exactly (fused-weight layout)
# ---------------------------------------------------------------------------
def lstm_reference(x, wx, wh, b):
    S, B, D = x.shape
    H = wh.shape[0]
    h = jnp.zeros((B, H), x.dtype)
    c = jnp.zeros((B, H), x.dtype)
    outs = []
    for t in range(S):
        pre = x[t] @ wx + h @ wh + b
        ft = jax.nn.sigmoid(pre[:, 0:H])
        it = jax.nn.sigmoid(pre[:, H:2 * H])
        ct_hat = jnp.tanh(pre[:, 2 * H:3 * H])
        ot = jax.nn.sigmoid(pre[:, 3 * H:4 * H])
        c = ft * c + it + ct_hat                 # reference quirk preserved
        h = ot * jnp.tanh(c)
        outs.append(h)
    return jnp.stack(outs), (h, c)


if __name__ == "__main__":
    SEQ, BATCH, INPUT, HIDDEN = 8, 2, 16, 32

    key = jax.random.PRNGKey(0)
    kx, kwx, kwh, kb = jax.random.split(key, 4)

    # Deterministic param init, mimicking nn.Linear's uniform(-1/sqrt(fan_in), +).
    fan_in = INPUT + HIDDEN
    bound = 1.0 / (fan_in ** 0.5)
    x = jax.random.normal(kx, (SEQ, BATCH, INPUT), dtype=jnp.float32)
    wx = jax.random.uniform(kwx, (INPUT, 4 * HIDDEN), minval=-bound, maxval=bound,
                            dtype=jnp.float32)
    wh = jax.random.uniform(kwh, (HIDDEN, 4 * HIDDEN), minval=-bound, maxval=bound,
                            dtype=jnp.float32)
    b = jax.random.uniform(kb, (1, 4 * HIDDEN), minval=-bound, maxval=bound,
                           dtype=jnp.float32)

    out, (h_n, c_n) = jax.block_until_ready(lstm_forward(x, wx, wh, b))

    ref_out, (ref_h, ref_c) = lstm_reference(x, wx, wh, b)
    assert jnp.allclose(out, ref_out, atol=1e-5), "output mismatch"
    assert jnp.allclose(h_n, ref_h, atol=1e-5), "h_n mismatch"
    assert jnp.allclose(c_n, ref_c, atol=1e-5), "c_n mismatch"

    print("KERNEL_OK")
</pallas_src>

<mosaic_0001>
module attributes {stable_mosaic.version = 11 : i64} {
  func.func @_input_proj_kernel(%arg0: i32, %arg1: memref<16x16xf32, #tpu.memory_space<vmem>>, %arg2: memref<16x128xf32, #tpu.memory_space<vmem>>, %arg3: memref<1x128xf32, #tpu.memory_space<vmem>>, %arg4: memref<16x128xf32, #tpu.memory_space<vmem>>) attributes {dimension_semantics = [#tpu.dimension_semantics<parallel>], iteration_bounds = array<i64: 1>, scalar_prefetch = 0 : i64, scratch_operands = 0 : i64, tpu.core_type = #tpu.core_type<tc>, window_params = [{transform_indices = @transform_0, window_bounds = array<i64: 16, 16>}, {pipeline_mode = #tpu.pipeline_mode<synchronous>, transform_indices = @transform_1, window_bounds = array<i64: 16, 128>}, {pipeline_mode = #tpu.pipeline_mode<synchronous>, transform_indices = @transform_2, window_bounds = array<i64: 1, 128>}, {transform_indices = @transform_3, window_bounds = array<i64: 16, 128>}]} {
    %c0 = arith.constant 0 : index
    %c0_0 = arith.constant 0 : index
    %0 = vector.load %arg1[%c0, %c0_0] : memref<16x16xf32, #tpu.memory_space<vmem>>, vector<16x16xf32>
    %c0_1 = arith.constant 0 : index
    %c0_2 = arith.constant 0 : index
    %1 = vector.load %arg2[%c0_1, %c0_2] : memref<16x128xf32, #tpu.memory_space<vmem>>, vector<16x128xf32>
    %cst = arith.constant dense<0.000000e+00> : vector<16x128xf32>
    %2 = tpu.matmul %0, %1, %cst {dimension_numbers = #tpu.dot_dimension_numbers<[1], [0], [0], [1], [0, 0, 1, 1], [], []>} : vector<16x16xf32>, vector<16x128xf32>, vector<16x128xf32> -> vector<16x128xf32>
    %c0_3 = arith.constant 0 : index
    %c0_4 = arith.constant 0 : index
    %3 = vector.load %arg3[%c0_3, %c0_4] : memref<1x128xf32, #tpu.memory_space<vmem>>, vector<1x128xf32>
    %4 = vector.broadcast %3 : vector<1x128xf32> to vector<16x128xf32>
    %5 = arith.addf %2, %4 : vector<16x128xf32>
    %c0_5 = arith.constant 0 : index
    %c0_6 = arith.constant 0 : index
    %6 = vector.load %arg4[%c0_5, %c0_6] : memref<16x128xf32, #tpu.memory_space<vmem>>, vector<16x128xf32>
    tpu.vector_store %arg4[%c0_5, %c0_6], %5 {strides = array<i32>} : memref<16x128xf32, #tpu.memory_space<vmem>>, vector<16x128xf32>,
    return
  }
  func.func @transform_0(%arg0: i32) -> (i32, i32) {
    %c0_i32 = arith.constant 0 : i32
    %c0_i32_0 = arith.constant 0 : i32
    return %arg0, %c0_i32 : i32, i32
  }
  func.func @transform_1(%arg0: i32) -> (i32, i32) {
    %c0_i32 = arith.constant 0 : i32
    %c0_i32_0 = arith.constant 0 : i32
    %c0_i32_1 = arith.constant 0 : i32
    return %c0_i32, %c0_i32_0 : i32, i32
  }
  func.func @transform_2(%arg0: i32) -> (i32, i32) {
    %c0_i32 = arith.constant 0 : i32
    %c0_i32_0 = arith.constant 0 : i32
    %c0_i32_1 = arith.constant 0 : i32
    return %c0_i32, %c0_i32_0 : i32, i32
  }
  func.func @transform_3(%arg0: i32) -> (i32, i32) {
    %c0_i32 = arith.constant 0 : i32
    %c0_i32_0 = arith.constant 0 : i32
    return %arg0, %c0_i32 : i32, i32
  }
}

</mosaic_0001>

<bundles_post_ra>
// kernel: tpu_custom_call.1
= control target key start
LH: loop header
LB: loop body
LE: loop exit
PB: predicated region body
PF: predicated region fallthrough
CT: control target
= control target key end

     0   :  { %8 = vsyncpa [#allocation3], 0  ;;  %s324_s0 = inlined_call_operand.hbm [shape: f32[16,16], index: 0, kind: input, shape index: {}]   ;;  %s325_s1 = inlined_call_operand.hbm [shape: f32[16,128], index: 1, kind: input, shape index: {}]   ;;  %s326_s2 = inlined_call_operand.vmem [shape: f32[1,128], index: 2, kind: input, shape index: {}]   ;;  %s327_s3 = inlined_call_operand.hbm [shape: f32[16,128], index: 3, kind: output, shape index: {}]  }
   0x1   :  { %9 = vsyncpa [#allocation6], 0 }
   0x2   :  { %10 = vsyncpa [#allocation4], 0  ;;  %s251_s12 = smov [#allocation2]   ;;  %s179_s16 = scalar_lea.hbm %s324_s0, 256 }
   0x3   :  { %s16_s13 = sshll.u32 %s251_s12, 4  ;;  %p180_p0 = scmp.ne.s32.totalorder %s324_s0, %s179_s16  ;;  %s17_s13 = int_to_ptr.vmem [resolvable:$true] %s16_s13 }
   0x4   :  { %p183_p1 = scmp.lt.u32.totalorder %s179_s16, %s324_s0 }
   0x6   :  { %p185_p2 = pnand %p183_p1, %p180_p0 }
   0x8   :  { %188 = shalt.err (!%p185_p2)
}
   0x9   :  { %s189_s21 = scalar_lea.vmem %s17_s13, 256  ;;  %p194_p4 = scmp.lt.s32.totalorder %s17_s13, %s17_s13 }
   0xa   :  { %p190_p3 = scmp.ne.s32.totalorder %s17_s13, %s189_s21  ;;  %p195_p5 = scmp.lt.s32.totalorder %s189_s21, %s189_s21 }
   0xc   :  { %p196_p6 = por %p195_p5, %p194_p4 }
   0xe   :  { %p197_p7 = pnand %p196_p6, %p190_p3 }
  0x10   :  { %200 = shalt.err (!%p197_p7)
}
  0x11   :  { %s252_s22 = smov 128   ;;  %s253_s23 = smov 8  }
  0x12   :  { %22 = dma.hbm_to_vmem [thread:$0]  %s324_s0, 256, %s17_s13, [#allocation3], %s252_s22, %s252_s22, %s253_s23  }
  0x13   :  { %s254_s26 = smov [#allocation5]   ;;  %s201_s30 = scalar_lea.hbm %s325_s1, 256 }
  0x14   :  { %s28_s27 = sshll.u32 %s254_s26, 4  ;;  %p202_p8 = scmp.ne.s32.totalorder %s325_s1, %s201_s30  ;;  %s29_s27 = int_to_ptr.vmem [resolvable:$true] %s28_s27 }
  0x15   :  { %p205_p9 = scmp.lt.u32.totalorder %s201_s30, %s325_s1 }
  0x17   :  { %p207_p10 = pnand %p205_p9, %p202_p8 }
  0x19   :  { %210 = shalt.err (!%p207_p10)
}
  0x1a   :  { %s211_s8 = scalar_lea.vmem %s29_s27, 256  ;;  %p216_p12 = scmp.lt.s32.totalorder %s29_s27, %s29_s27 }
  0x1b   :  { %p212_p11 = scmp.ne.s32.totalorder %s29_s27, %s211_s8  ;;  %p217_p13 = scmp.lt.s32.totalorder %s211_s8, %s211_s8 }
  0x1d   :  { %p218_p0 = por %p217_p13, %p216_p12 }
  0x1f   :  { %p219_p1 = pnand %p218_p0, %p212_p11 }
  0x21   :  { %222 = shalt.err (!%p219_p1)
}
  0x22   :  { %34 = dma.hbm_to_vmem [thread:$0]  %s325_s1, 256, %s29_s27, [#allocation6], %s252_s22, %s252_s22, %s253_s23  }
  0x23   :  { %245 = dma.done.wait [#allocation3], 256  }
  0x24   :  { %246 = vsyncadd [#allocation3], 4294967040 }
  0x25   :  { %247 = dma.done.wait [#allocation6], 256  }
  0x26   :  { %248 = vsyncadd [#allocation6], 4294967040  ;;  %vm54_vm0 = vcmask 130048   ;;  %v45_v0 = vld [vmem:[#allocation5] sm:$0xff]  ;;  %v46_v1 = vld [vmem:[#allocation5 + $0x8] sm:$0xff]  ;;  %s255_s12 = smov [#allocation7]  }
  0x27   :  { %v43_v2 = vld [vmem:[#allocation2] sm:$0xff]  ;;  %v170_v3 = vpack.c.bf16 %v46_v1, %v45_v0  ;;  %v44_v4 = vld [vmem:[#allocation2 + $0x8] sm:$0xff]  ;;  %s143_s1 = sshll.u32 %s255_s12, 4  ;;  %s144_s1 = int_to_ptr.vmem [resolvable:$true] %s143_s1 }
  0x28   :  { %167 = vmatprep.mubr.msk.f32.mxu0 %vm54_vm0, %v43_v2  ;;  %v156_v5 = vld [vmem:[%s326_s2] ss:$0 sm:$0xff]  ;;  %s223_s13 = scalar_lea.vmem %s144_s1, 256  ;;  %p228_p3 = scmp.lt.s32.totalorder %s144_s1, %s144_s1 }
  0x29   :  { %171 = vmatprep.subr.bf16.mxu0 %v170_v3  ;;  %p224_p2 = scmp.ne.s32.totalorder %s144_s1, %s223_s13  ;;  %p229_p4 = scmp.lt.s32.totalorder %s223_s13, %s223_s13 }
  0x2a   :  { %173 = vmatpush3.bf16.msra.mxu0 %v170_v3 }
  0x2b   :  { %p230_p5 = por %p229_p4, %p228_p3 }
  0x2d   :  { %168 = vmatmul.mubr.msk.f32.vlgmr.msra.gmra.mrb[0].mxu0 %vm54_vm0, %v44_v4  ;;  %p231_p6 = pnand %p230_p5, %p224_p2 }
 0x100   :  { %v169_v6 = vpop.f32.mrb[0].mxu0 }
 0x101   :  { %v133_v7 = vadd.f32 %v169_v6, %v156_v5  ;;  %v127_v8 = vpop.f32.mrb[1].mxu0 }
 0x102   :  { %v128_v9 = vadd.f32 %v156_v5, %v127_v8 }
 0x103   :  { %137 = vst [vmem:[#allocation7 + $0x8] sm:$0xff] %v133_v7 }
 0x104   :  { %136 = vst [vmem:[#allocation7] sm:$0xff] %v128_v9 }
 0x105   :  { %234 = shalt.err (!%p231_p6)
}
 0x106   :  { %s235_s2 = scalar_lea.hbm %s327_s3, 256 }
 0x107   :  { %p236_p7 = scmp.ne.s32.totalorder %s327_s3, %s235_s2  ;;  %p239_p8 = scmp.lt.u32.totalorder %s235_s2, %s327_s3 }
 0x109   :  { %p241_p9 = pnand %p239_p8, %p236_p7 }
 0x10b   :  { %244 = shalt.err (!%p241_p9)
}
 0x10c   :  { %149 = dma.vmem_to_hbm [thread:$0]  %s144_s1, 256, %s327_s3, [#allocation4], %s252_s22, %s252_s22, %s253_s23  }
 0x10d   :  { %249 = dma.done.wait [#allocation4], 256  }
 0x10e   :  { %250 = vsyncadd [#allocation4], 4294967040 }
 0x10f   :  { %153 = vsyncpa [#allocation3], 1 }
 0x110   :  { %154 = vsyncpa [#allocation6], 1 }
 0x111   :  { %155 = vsyncpa [#allocation4], 1 }

</bundles_post_ra>
